<compile_context>
chip_gen: v5e
topology: v5e:2x2
jax: 0.10.0
libtpu: 0.0.40
codegen_flags: <defaults>
</compile_context>

<pallas_src>
import math
from functools import partial

import jax
import jax.numpy as jnp
import numpy as np
from jax.experimental import pallas as pl
from jax.experimental.pallas import tpu as pltpu

_CompilerParams = getattr(pltpu, "CompilerParams", None) or getattr(pltpu, "TPUCompilerParams")


# --------------------------------------------------------------------------- #
# Small helpers
# --------------------------------------------------------------------------- #
def _round_up(x, m):
    return ((x + m - 1) // m) * m


def _halo_width(pad):
    """Smallest power-of-two multiple of 128 covering 2*pad columns."""
    need = max(1, 2 * pad)
    h = 128
    while h < need:
        h *= 2
    return h


def _vmem_budget_bytes():
    cap = 64 * 1024 * 1024
    try:
        cap = int(pltpu.get_tpu_info().vmem_capacity_bytes)
    except Exception:
        pass
    return int(0.8 * cap)            # headroom for Mosaic internal scratch


def _vmem_estimate(*, TL, halo, pad, K, Cin_p, Cout_p, M1, Cout, itemsize, out_itemsize):
    Hc = TL + pad
    xw_w = TL + halo
    io = Cin_p * xw_w * itemsize + Cout * TL * out_itemsize
    wts = (M1 * K * Cin_p + Cout_p * K * Cout_p) * itemsize + (M1 + Cout_p) * 4
    work = (Cin_p * xw_w * itemsize            # xw concat
            + K * Cin_p * Hc * itemsize        # x_cols
            + M1 * Hc * 4                      # fused (f32)
            + Cout_p * Hc * (4 + itemsize)     # h1 f32 + compute-dtype copy
            + K * Cout_p * TL * itemsize       # h_cols
            + 3 * Cout_p * TL * 4)             # acc2 / res / out (f32)
    return 2 * (io + wts) + work               # I/O + weights double-buffered


def _choose_time_tile(L, pad, budget, est_kw, preferred=(2048, 1024, 512, 256, 128)):
    """Largest preferred tile that divides L, covers the halo, and fits VMEM."""
    halo = _halo_width(pad)
    for t in preferred:
        if t < L and L % t == 0 and t >= halo:
            est = _vmem_estimate(TL=t, halo=halo, pad=pad, **est_kw)
            if est <= budget:
                return t, halo, est
    est = _vmem_estimate(TL=L, halo=max(halo, 128), pad=pad, **est_kw)
    return None, halo, est


# --------------------------------------------------------------------------- #
# Kernels
# --------------------------------------------------------------------------- #
def _tb_body(xw, t0, w1_ref, b1_ref, w2_ref, b2_ref, o_ref, *,
             K, dilation, pad, TL, Cout_p, Cout, fold_residual):
    """Shared compute for one (batch, time-tile) step.

    xw      : (Cin_p, >= TL + 2*pad) x window (compute dtype); column c is padded-x
              column t0 + c, where the physical left pad is 2*pad.
    w1_ref  : (M1, K*Cin_p) conv1 taps stacked along the contraction axis; if the
              residual is folded, rows [Cout_p:2*Cout_p] hold the 1x1 downsample
              weight (active only in the tap-(K-1) column block).
    b1_ref  : (M1, 1) f32   conv1 bias (+ downsample bias rows if folded)
    w2_ref  : (Cout_p, K*Cout_p), b2_ref : (Cout_p, 1) f32
    o_ref   : (1, Cout, TL)
    """
    cdt = w1_ref.dtype
    Hc = TL + pad                                     # pad-wide conv1 halo + TL outputs

    # ---- conv1 (+ folded residual rows): one deep-contraction MXU matmul ----
    x_cols = jnp.concatenate(
        [xw[:, k * dilation: k * dilation + Hc] for k in range(K)], axis=0)
    fused = jnp.dot(w1_ref[...], x_cols,
                    preferred_element_type=jnp.float32) + b1_ref[...]

    h1 = jnp.maximum(fused[:Cout_p], 0.0)
    # conv1 outputs left of the sequence start are conv2's zero padding, not relu(b1)
    col = jax.lax.broadcasted_iota(jnp.int32, (1, Hc), 1)
    h1 = jnp.where(col + t0 < pad, 0.0, h1).astype(cdt)
    # dropout == identity (eval mode)

    # ---- conv2 over the TL real output columns ----
    h_cols = jnp.concatenate(
        [h1[:, k * dilation: k * dilation + TL] for k in range(K)], axis=0)
    acc2 = jnp.dot(w2_ref[...], h_cols,
                   preferred_element_type=jnp.float32) + b2_ref[...]
    acc2 = jnp.maximum(acc2, 0.0)
    # dropout == identity (eval mode)

    # ---- residual + final ReLU (f32 epilogue) ----
    if fold_residual:
        res = fused[Cout_p:, pad: pad + TL]                       # folded 1x1 conv rows
    else:
        res = xw[:, 2 * pad: 2 * pad + TL].astype(jnp.float32)    # identity (Cin_p == Cout_p)

    out = jnp.maximum(acc2 + res, 0.0)
    o_ref[0] = out[:Cout].astype(o_ref.dtype)


def _tb_kernel_single(x_ref, w1_ref, b1_ref, w2_ref, b2_ref, o_ref, **kw):
    """Whole sequence in one tile; grid = (N,).  x_ref: (1, Cin_p, 2*pad + L)."""
    _tb_body(x_ref[0], 0, w1_ref, b1_ref, w2_ref, b2_ref, o_ref, **kw)


def _tb_kernel_tiled(xa_ref, xb_ref, w1_ref, b1_ref, w2_ref, b2_ref, o_ref, **kw):
    """Time-tiled; grid = (N, L // TL).  xa: (1,Cin_p,TL) tile, xb: (1,Cin_p,HALO) halo."""
    t0 = pl.program_id(1) * kw["TL"]
    xw = jnp.concatenate([xa_ref[0], xb_ref[0]], axis=1)          # (Cin_p, TL + HALO)
    _tb_body(xw, t0, w1_ref, b1_ref, w2_ref, b2_ref, o_ref, **kw)


# --------------------------------------------------------------------------- #
# Wrapper
# --------------------------------------------------------------------------- #
def temporal_block(x_ncl, w1, b1, w2, b2, wd, bd, kernel_size, dilation,
                   *, compute_dtype=jnp.bfloat16):
    """Forward pass matching TemporalBlock.forward (eval mode).

    x_ncl : (N, C_in, L) PyTorch NCL layout (stays NCL end to end)
    w1    : (C_out, C_in, K),  b1: (C_out,)
    w2    : (C_out, C_out, K), b2: (C_out,)
    wd    : (C_out, C_in, 1) or None, bd: (C_out,) or None
    returns (N, C_out, L), dtype of x_ncl.
    """
    N, Cin, L = x_ncl.shape
    Cout = w1.shape[0]
    K = int(kernel_size)
    d = int(dilation)
    pad = (K - 1) * d
    out_dtype = x_ncl.dtype
    if wd is None and Cin != Cout:
        raise ValueError("wd=None requires Cin == Cout (identity residual).")

    itemsize = jnp.dtype(compute_dtype).itemsize
    out_itemsize = jnp.dtype(out_dtype).itemsize
    sub = max(8, 32 // itemsize)                 # sublane multiple for the compute dtype
    Cin_p = _round_up(Cin, sub)
    Cout_p = _round_up(Cout, sub)
    fold = wd is not None
    M1 = 2 * Cout_p if fold else Cout_p

    # ---- pack parameters (channel-padded, taps stacked along the contraction axis) ----
    f32 = jnp.float32
    w1p = jnp.zeros((Cout_p, K, Cin_p), f32).at[:Cout, :, :Cin].set(
        jnp.transpose(w1.astype(f32), (0, 2, 1)))
    w1s = w1p.reshape(Cout_p, K * Cin_p)
    b1p = jnp.zeros((Cout_p,), f32).at[:Cout].set(b1.astype(f32))

    w2p = jnp.zeros((Cout_p, K, Cout_p), f32).at[:Cout, :, :Cout].set(
        jnp.transpose(w2.astype(f32), (0, 2, 1)))
    w2s = w2p.reshape(Cout_p, K * Cout_p).astype(compute_dtype)
    b2r = jnp.zeros((Cout_p, 1), f32).at[:Cout, 0].set(b2.astype(f32))

    if fold:
        # Stack the 1x1 downsample as extra conv1 rows, active only in the tap-(K-1)
        # column block (that tap's RHS slice is exactly the unshifted x window).
        wds = jnp.zeros((Cout_p, K * Cin_p), f32).at[
            :Cout, (K - 1) * Cin_p:(K - 1) * Cin_p + Cin].set(wd[:, :, 0].astype(f32))
        w1e = jnp.concatenate([w1s, wds], axis=0).astype(compute_dtype)   # (2*Cout_p, K*Cin_p)
        bdp = jnp.zeros((Cout_p,), f32).at[:Cout].set(bd.astype(f32))
        b1e = jnp.concatenate([b1p, bdp]).reshape(M1, 1)
    else:
        w1e = w1s.astype(compute_dtype)
        b1e = b1p.reshape(M1, 1)

    # ---- time tiling chosen against the per-generation VMEM budget ----
    budget = _vmem_budget_bytes()
    est_kw = dict(K=K, Cin_p=Cin_p, Cout_p=Cout_p, M1=M1, Cout=Cout,
                  itemsize=itemsize, out_itemsize=out_itemsize)
    TL, halo, vmem_est = _choose_time_tile(L, pad, budget, est_kw)
    if TL is None and vmem_est > budget:
        raise ValueError(
            f"TemporalBlock single-tile fallback needs ~{vmem_est / 2**20:.1f} MiB VMEM "
            f"(budget {budget / 2**20:.1f} MiB); sequence length {L} is not tileable.")

    # ---- x: channel-pad + cast + time-pad (fuses into one XLA copy) ----
    x_c = x_ncl.astype(compute_dtype)
    if Cin_p != Cin:
        x_c = jnp.pad(x_c, ((0, 0), (0, Cin_p - Cin), (0, 0)))

    if TL is None:
        # single time tile: left-pad by 2*pad; kernel masks the pad-wide conv1 halo
        xp = jnp.pad(x_c, ((0, 0), (0, 0), (2 * pad, 0)))
        kern = partial(_tb_kernel_single, K=K, dilation=d, pad=pad, TL=L,
                       Cout_p=Cout_p, Cout=Cout, fold_residual=fold)
        grid = (N,)
        in_specs = [
            pl.BlockSpec((1, Cin_p, 2 * pad + L), lambda n: (n, 0, 0)),
            pl.BlockSpec((M1, K * Cin_p), lambda n: (0, 0)),
            pl.BlockSpec((M1, 1), lambda n: (0, 0)),
            pl.BlockSpec((Cout_p, K * Cout_p), lambda n: (0, 0)),
            pl.BlockSpec((Cout_p, 1), lambda n: (0, 0)),
        ]
        out_specs = pl.BlockSpec((1, Cout, L), lambda n: (n, 0, 0))
        operands = (xp, w1e, b1e, w2s, b2r)
        dims = ("parallel",)
    else:
        # time-tiled: narrow HALO block (>= 2*pad, multiple of 128, divides TL)
        # delivers the overlap -> x HBM traffic ~(TL+HALO)/TL instead of 2x.
        num_l = L // TL
        padded_len = _round_up(L + halo, TL)          # both block widths tile it exactly
        rpad = padded_len - (2 * pad + L)
        xp = jnp.pad(x_c, ((0, 0), (0, 0), (2 * pad, rpad)))
        ratio = TL // halo
        kern = partial(_tb_kernel_tiled, K=K, dilation=d, pad=pad, TL=TL,
                       Cout_p=Cout_p, Cout=Cout, fold_residual=fold)
        grid = (N, num_l)
        in_specs = [
            pl.BlockSpec((1, Cin_p, TL), lambda n, l: (n, 0, l)),
            pl.BlockSpec((1, Cin_p, halo), lambda n, l: (n, 0, (l + 1) * ratio)),
            pl.BlockSpec((M1, K * Cin_p), lambda n, l: (0, 0)),
            pl.BlockSpec((M1, 1), lambda n, l: (0, 0)),
            pl.BlockSpec((Cout_p, K * Cout_p), lambda n, l: (0, 0)),
            pl.BlockSpec((Cout_p, 1), lambda n, l: (0, 0)),
        ]
        out_specs = pl.BlockSpec((1, Cout, TL), lambda n, l: (n, 0, l))
        operands = (xp, xp, w1e, b1e, w2s, b2r)
        dims = ("parallel", "parallel")

    vmem_limit = int(min(budget, max(2 * vmem_est, 32 * 1024 * 1024)))

    return pl.pallas_call(
        kern,
        out_shape=jax.ShapeDtypeStruct((N, Cout, L), out_dtype),
        grid=grid,
        in_specs=in_specs,
        out_specs=out_specs,
        compiler_params=_CompilerParams(
            dimension_semantics=dims,
            vmem_limit_bytes=vmem_limit),
    )(*operands)


# --------------------------------------------------------------------------- #
# Reference (plain JAX, mirrors PyTorch module in eval mode) and init helpers
# --------------------------------------------------------------------------- #
def ref_temporal_block(x, w1, b1, w2, b2, wd, bd, K, d):
    pad = (K - 1) * d
    dn = ("NCH", "OIH", "NCH")
    hp = jax.lax.Precision.HIGHEST

    def dconv(inp, w, b):
        y = jax.lax.conv_general_dilated(inp, w, window_strides=(1,), padding=[(pad, pad)],
                                         rhs_dilation=(d,), dimension_numbers=dn, precision=hp)
        return y + b[None, :, None]

    L = x.shape[2]
    out = jax.nn.relu(dconv(x, w1, b1))
    out = jax.nn.relu(dconv(out, w2, b2))
    if wd is not None:
        res = jax.lax.conv_general_dilated(x, wd, window_strides=(1,), padding=[(0, 0)],
                                           dimension_numbers=dn, precision=hp)
        res = res + bd[None, :, None]
    else:
        res = x
    return jax.nn.relu(out[:, :, :L] + res[:, :, :L])


def _kaiming_normal(key, shape):
    # PyTorch kaiming_normal_ default: fan_in mode, gain = sqrt(2); shape = (C_out, C_in, K)
    fan_in = shape[1] * shape[2]
    std = math.sqrt(2.0 / fan_in)
    return std * jax.random.normal(key, shape, jnp.float32)


def _conv_bias(key, c_out, fan_in):
    bound = 1.0 / math.sqrt(fan_in)
    return jax.random.uniform(key, (c_out,), jnp.float32, -bound, bound)


def _make_params(key, Cin, Cout, K):
    k1w, k1b, k2w, k2b, kdw, kdb = jax.random.split(key, 6)
    w1 = _kaiming_normal(k1w, (Cout, Cin, K))
    b1 = _conv_bias(k1b, Cout, Cin * K)
    w2 = _kaiming_normal(k2w, (Cout, Cout, K))
    b2 = _conv_bias(k2b, Cout, Cout * K)
    if Cin != Cout:
        wd = _kaiming_normal(kdw, (Cout, Cin, 1))
        bd = _conv_bias(kdb, Cout, Cin)
    else:
        wd, bd = None, None
    return w1, b1, w2, b2, wd, bd


if __name__ == "__main__":
    key = jax.random.PRNGKey(0)

    configs = [
        (2, 4, 8, 16, 3, 2),    # small: single-tile kernel, folded 1x1 residual
        (2, 4, 8, 256, 3, 4),   # longer: time-tiled path (TL=128, 128-wide halo block)
        (2, 8, 8, 16, 3, 2),    # Cin == Cout: identity-residual (no downsample) path
    ]
    for (N, Cin, Cout, L, K, dil) in configs:
        kx, kp, key = jax.random.split(key, 3)
        x = jax.random.normal(kx, (N, Cin, L), jnp.float32)
        params = _make_params(kp, Cin, Cout, K)

        ref = ref_temporal_block(x, *params, K, dil)

        # f32 compute path: validates indexing / halo / residual-fold logic
        y32 = temporal_block(x, *params, K, dil, compute_dtype=jnp.float32)
        jax.block_until_ready(y32)
        assert y32.shape == (N, Cout, L), y32.shape
        np.testing.assert_allclose(np.asarray(y32), np.asarray(ref), rtol=3e-2, atol=3e-2)

        # default fast path: bf16 MXU operands, f32 accumulation / epilogue
        y = temporal_block(x, *params, K, dil)
        jax.block_until_ready(y)
        assert y.shape == (N, Cout, L), y.shape
        np.testing.assert_allclose(np.asarray(y, dtype=np.float32), np.asarray(ref),
                                   rtol=1e-1, atol=1e-1)

    print("KERNEL_OK")
</pallas_src>

<mosaic_0001>
module attributes {stable_mosaic.version = 11 : i64} {
  func.func @_tb_kernel_single(%arg0: i32, %arg1: memref<1x8x24xf32, #tpu.memory_space<vmem>>, %arg2: memref<16x24xf32, #tpu.memory_space<vmem>>, %arg3: memref<16x1xf32, #tpu.memory_space<vmem>>, %arg4: memref<8x24xf32, #tpu.memory_space<vmem>>, %arg5: memref<8x1xf32, #tpu.memory_space<vmem>>, %arg6: memref<1x8x16xf32, #tpu.memory_space<vmem>>) attributes {dimension_semantics = [#tpu.dimension_semantics<parallel>], iteration_bounds = array<i64: 2>, scalar_prefetch = 0 : i64, scratch_operands = 0 : i64, tpu.core_type = #tpu.core_type<tc>, window_params = [{transform_indices = @transform_0, window_bounds = array<i64: 1, 8, 24>}, {pipeline_mode = #tpu.pipeline_mode<synchronous>, transform_indices = @transform_1, window_bounds = array<i64: 16, 24>}, {pipeline_mode = #tpu.pipeline_mode<synchronous>, transform_indices = @transform_2, window_bounds = array<i64: 16, 1>}, {pipeline_mode = #tpu.pipeline_mode<synchronous>, transform_indices = @transform_3, window_bounds = array<i64: 8, 24>}, {pipeline_mode = #tpu.pipeline_mode<synchronous>, transform_indices = @transform_4, window_bounds = array<i64: 8, 1>}, {transform_indices = @transform_5, window_bounds = array<i64: 1, 8, 16>}]} {
    %c0 = arith.constant 0 : index
    %c0_0 = arith.constant 0 : index
    %c0_1 = arith.constant 0 : index
    %0 = vector.load %arg1[%c0, %c0_0, %c0_1] : memref<1x8x24xf32, #tpu.memory_space<vmem>>, vector<1x8x24xf32>
    %1 = vector.shape_cast %0 : vector<1x8x24xf32> to vector<8x24xf32>
    %2 = vector.extract_strided_slice %1 {offsets = [0, 0], sizes = [8, 20], strides = [1, 1]} : vector<8x24xf32> to vector<8x20xf32>
    %3 = vector.extract_strided_slice %1 {offsets = [0, 2], sizes = [8, 20], strides = [1, 1]} : vector<8x24xf32> to vector<8x20xf32>
    %4 = vector.extract_strided_slice %1 {offsets = [0, 4], sizes = [8, 20], strides = [1, 1]} : vector<8x24xf32> to vector<8x20xf32>
    %5 = tpu.concatenate %2, %3, %4 in 0 : vector<8x20xf32>, vector<8x20xf32>, vector<8x20xf32> -> vector<24x20xf32>
    %c0_2 = arith.constant 0 : index
    %c0_3 = arith.constant 0 : index
    %6 = vector.load %arg2[%c0_2, %c0_3] : memref<16x24xf32, #tpu.memory_space<vmem>>, vector<16x24xf32>
    %cst = arith.constant dense<0.000000e+00> : vector<16x20xf32>
    %7 = tpu.matmul %6, %5, %cst {dimension_numbers = #tpu.dot_dimension_numbers<[1], [0], [0], [1], [0, 0, 1, 1], [], []>} : vector<16x24xf32>, vector<24x20xf32>, vector<16x20xf32> -> vector<16x20xf32>
    %c0_4 = arith.constant 0 : index
    %c0_5 = arith.constant 0 : index
    %8 = vector.load %arg3[%c0_4, %c0_5] : memref<16x1xf32, #tpu.memory_space<vmem>>, vector<16x1xf32>
    %9 = vector.broadcast %8 : vector<16x1xf32> to vector<16x20xf32>
    %10 = arith.addf %7, %9 : vector<16x20xf32>
    %11 = vector.extract_strided_slice %10 {offsets = [0, 0], sizes = [8, 20], strides = [1, 1]} : vector<16x20xf32> to vector<8x20xf32>
    %cst_6 = arith.constant 0.000000e+00 : f32
    %12 = vector.broadcast %cst_6 : f32 to vector<8x20xf32>
    %13 = arith.maximumf %11, %12 : vector<8x20xf32>
    %14 = tpu.iota {dimensions = array<i32: 1>} : vector<1x20xi32>
    %c0_i32 = arith.constant 0 : i32
    %15 = vector.broadcast %c0_i32 : i32 to vector<1x20xi32>
    %16 = arith.addi %14, %15 : vector<1x20xi32>
    %c4_i32 = arith.constant 4 : i32
    %17 = vector.broadcast %c4_i32 : i32 to vector<1x20xi32>
    %18 = arith.cmpi slt, %16, %17 : vector<1x20xi32>
    %cst_7 = arith.constant 0.000000e+00 : f32
    %19 = vector.shape_cast %18 : vector<1x20xi1> to vector<1x20xi1>
    %20 = vector.broadcast %19 : vector<1x20xi1> to vector<8x20xi1>
    %21 = vector.broadcast %cst_7 : f32 to vector<8x20xf32>
    %22 = arith.select %20, %21, %13 : vector<8x20xi1>, vector<8x20xf32>
    %23 = vector.extract_strided_slice %22 {offsets = [0, 0], sizes = [8, 16], strides = [1, 1]} : vector<8x20xf32> to vector<8x16xf32>
    %24 = vector.extract_strided_slice %22 {offsets = [0, 2], sizes = [8, 16], strides = [1, 1]} : vector<8x20xf32> to vector<8x16xf32>
    %25 = vector.extract_strided_slice %22 {offsets = [0, 4], sizes = [8, 16], strides = [1, 1]} : vector<8x20xf32> to vector<8x16xf32>
    %26 = tpu.concatenate %23, %24, %25 in 0 : vector<8x16xf32>, vector<8x16xf32>, vector<8x16xf32> -> vector<24x16xf32>
    %c0_8 = arith.constant 0 : index
    %c0_9 = arith.constant 0 : index
    %27 = vector.load %arg4[%c0_8, %c0_9] : memref<8x24xf32, #tpu.memory_space<vmem>>, vector<8x24xf32>
    %cst_10 = arith.constant dense<0.000000e+00> : vector<8x16xf32>
    %28 = tpu.matmul %27, %26, %cst_10 {dimension_numbers = #tpu.dot_dimension_numbers<[1], [0], [0], [1], [0, 0, 1, 1], [], []>} : vector<8x24xf32>, vector<24x16xf32>, vector<8x16xf32> -> vector<8x16xf32>
    %c0_11 = arith.constant 0 : index
    %c0_12 = arith.constant 0 : index
    %29 = vector.load %arg5[%c0_11, %c0_12] : memref<8x1xf32, #tpu.memory_space<vmem>>, vector<8x1xf32>
    %30 = vector.broadcast %29 : vector<8x1xf32> to vector<8x16xf32>
    %31 = arith.addf %28, %30 : vector<8x16xf32>
    %cst_13 = arith.constant 0.000000e+00 : f32
    %32 = vector.broadcast %cst_13 : f32 to vector<8x16xf32>
    %33 = arith.maximumf %31, %32 : vector<8x16xf32>
    %34 = vector.extract_strided_slice %10 {offsets = [8, 4], sizes = [8, 16], strides = [1, 1]} : vector<16x20xf32> to vector<8x16xf32>
    %35 = arith.addf %33, %34 : vector<8x16xf32>
    %cst_14 = arith.constant 0.000000e+00 : f32
    %36 = vector.broadcast %cst_14 : f32 to vector<8x16xf32>
    %37 = arith.maximumf %35, %36 : vector<8x16xf32>
    %c0_15 = arith.constant 0 : index
    %c0_16 = arith.constant 0 : index
    %c0_17 = arith.constant 0 : index
    %38 = vector.load %arg6[%c0_15, %c0_16, %c0_17] : memref<1x8x16xf32, #tpu.memory_space<vmem>>, vector<1x8x16xf32>
    %39 = vector.shape_cast %38 : vector<1x8x16xf32> to vector<8x16xf32>
    %40 = vector.shape_cast %37 : vector<8x16xf32> to vector<1x8x16xf32>
    tpu.vector_store %arg6[%c0_15, %c0_16, %c0_17], %40 {strides = array<i32>} : memref<1x8x16xf32, #tpu.memory_space<vmem>>, vector<1x8x16xf32>,
    return
  }
  func.func @transform_0(%arg0: i32) -> (i32, i32, i32) {
    %c0_i32 = arith.constant 0 : i32
    %c0_i32_0 = arith.constant 0 : i32
    %c0_i32_1 = arith.constant 0 : i32
    return %arg0, %c0_i32, %c0_i32_0 : i32, i32, i32
  }
  func.func @transform_1(%arg0: i32) -> (i32, i32) {
    %c0_i32 = arith.constant 0 : i32
    %c0_i32_0 = arith.constant 0 : i32
    %c0_i32_1 = arith.constant 0 : i32
    return %c0_i32, %c0_i32_0 : i32, i32
  }
  func.func @transform_2(%arg0: i32) -> (i32, i32) {
    %c0_i32 = arith.constant 0 : i32
    %c0_i32_0 = arith.constant 0 : i32
    %c0_i32_1 = arith.constant 0 : i32
    return %c0_i32, %c0_i32_0 : i32, i32
  }
  func.func @transform_3(%arg0: i32) -> (i32, i32) {
    %c0_i32 = arith.constant 0 : i32
    %c0_i32_0 = arith.constant 0 : i32
    %c0_i32_1 = arith.constant 0 : i32
    return %c0_i32, %c0_i32_0 : i32, i32
  }
  func.func @transform_4(%arg0: i32) -> (i32, i32) {
    %c0_i32 = arith.constant 0 : i32
    %c0_i32_0 = arith.constant 0 : i32
    %c0_i32_1 = arith.constant 0 : i32
    return %c0_i32, %c0_i32_0 : i32, i32
  }
  func.func @transform_5(%arg0: i32) -> (i32, i32, i32) {
    %c0_i32 = arith.constant 0 : i32
    %c0_i32_0 = arith.constant 0 : i32
    %c0_i32_1 = arith.constant 0 : i32
    return %arg0, %c0_i32, %c0_i32_0 : i32, i32, i32
  }
}

</mosaic_0001>

<bundles_post_ra>
// kernel: tpu_custom_call.1
= control target key start
LH: loop header
LB: loop body
LE: loop exit
PB: predicated region body
PF: predicated region fallthrough
CT: control target
= control target key end

     0   :  { %10 = vsyncpa [#allocation3], 0  ;;  %s756_s0 = inlined_call_operand.vmem [shape: f32[2,8,24], index: 0, kind: input, shape index: {}]   ;;  %s757_s1 = inlined_call_operand.hbm [shape: f32[16,24], index: 1, kind: input, shape index: {}]   ;;  %s758_s2 = inlined_call_operand.vmem [shape: f32[16,1], index: 2, kind: input, shape index: {}]   ;;  %s759_s3 = inlined_call_operand.vmem [shape: f32[8,24], index: 3, kind: input, shape index: {}]   ;;  %s760_s4 = inlined_call_operand.vmem [shape: f32[8,1], index: 4, kind: input, shape index: {}]   ;;  %s761_s5 = inlined_call_operand.hbm [shape: f32[2,8,16], index: 5, kind: output, shape index: {}]  }
   0x1   :  { %11 = vsyncpa [#allocation4], 0 }
   0x2   :  { %13 = vsyncpa [#allocation4 + $0x1], 0  ;;  %s641_s18 = smov 0   ;;  %s643_s19 = smov 0  }
   0x3   :  { %s645_s20 = smov 0   ;;  %s647_s21 = smov 0  }
   0x4 LB: > { %s662_s22 = sadd.s32 4294967295, %s603_s21   ;;  %s429_s23 = sadd.s32 4294967294, %s603_s21   ;;  %s603_s21 = sphi %s647_s21, %s767_s21   ;;  %s599_s20 = sphi %s645_s20, %s766_s20   ;;  %s595_s19 = sphi %s643_s19, %s765_s19   ;;  %s591_s18 = sphi %s641_s18, %s764_s18  }
   0x5   : > { %s666_s24 = sadd.s32 1, %s603_s21   ;;  %s136_s25 = sadd.s32 1, %s599_s20 }
   0x6   : > { %s133_s26 = ssub.s32 %s603_s21, %s666_s24  ;;  %p146_p0 = scmp.ne.s32.totalorder %s599_s20, %s595_s19 }
   0x7   : > { %p134_p1 = scmp.eq.s32.totalorder %s133_s26, 0  ;;  %p147_p2 = scmp.eq.s32.totalorder %s662_s22, 1 }
   0x8   : > { %p152_p3 = scmp.ne.s32.totalorder %s595_s19, %s591_s18  ;;  %p153_p4 = scmp.eq.s32.totalorder %s429_s23, 1 }
   0x9   : > { %s677_s27 = scalar_select %p134_p1, %s599_s20, %s136_s25  }
   0xa   : > { %p679_p5 = por %p147_p2, %p146_p0  ;;  %p683_p6 = por %p153_p4, %p152_p3 }
   0xb   : > { %p430_p7 = scmp.ge.s32.totalorder %s603_s21, 1  ;;  %p160_p8 = scmp.lt.s32.totalorder %s603_s21, 3 }
   0xc   : > { %p463_p9 = scmp.eq.s32.totalorder %s662_s22, 0  ;;  %s171_s7 = sshll.u32 %s757_s1, 4  ;;  %s172_s7 = int_to_ptr.hbm [resolvable:$true] %s171_s7 }
   0xd   : > { %p161_p10 = pnand %p430_p7, %p160_p8  ;;  %s605_s8 = smov [#allocation2]  }
   0xe   : > { %s173_s9 = sshll.u32 %s605_s8, 4  ;;  %s606_s10 = smov 128   ;;  %s174_s9 = int_to_ptr.vmem [resolvable:$true] %s173_s9 }
   0xf   : > { %p455_p11 = pneg %p161_p10  ;;  %s607_s11 = smov 8  }
  0x10   : > { %205 = sbr.rel (%p161_p10) target bundleno = 543 (0x21f), region = 40 }
  0x11   : > { %p456_p12 = pnand %p463_p9, %p455_p11 }
  0x13   : > { %458 = dma.hbm_to_vmem [thread:$0]  (!%p456_p12), %s172_s7, 256, %s174_s9, [#allocation3], %s606_s10, %s606_s10, %s607_s11  }
  0x15   : > { %582 = dma.done.wait (%p463_p9), [#allocation3], 256  }
  0x16   : > { %584 = vsyncadd (%p463_p9), [#allocation3], 4294967040  ;;  %p233_p13 = scmp.lt.s32.totalorder %s662_s22, 1  ;;  %s608_s17 = smov 124   ;;  %v247_v1 = vld [vmem:[%s758_s2] sm:$0xff]  ;;  %v610_v2 = vmov 0   ;;  %v290_v7 = vlaneseq }
  0x17   : > { %s609_s23 = smov 126   ;;  %504 = vset.pattern.permute.xlu1 %v610_v2  ;;  %505 = vset.pattern.permute.xlu2 %v610_v2  ;;  %v245_v5 = vld [vmem:[#allocation2] sm:$0xff]  ;;  %vm259_vm0 = vcmask 195584   ;;  %v246_v6 = vld [vmem:[#allocation2 + $0x8] sm:$0xff]  ;;  %s230_s11 = sand.u32 1, %s595_s19   ;;  %vm340_vm3 = vcmask 130048  }
  0x18   : > { %s234_s12 = scalar_select %p233_p13, %s662_s22, 1  ;;  %251 = vperm.xlu1 %504, %v247_v1   ;;  %506 = vset.pattern.permute.xlu0 %v610_v2  ;;  %v291_v9 = vand.u32 127, %v290_v7  ;;  %v248_v14 = vld [vmem:[%s758_s2 + $0x8] sm:$0xff]  ;;  %v304_v15 = vld [vmem:[%s760_s4] sm:$0xff] }
  0x19   : > { %v303_v21 = vld [vmem:[%s759_s3] sm:$0xff]  ;;  %s343_s26 = scalar_lea.sflag [#allocation4], %s230_s11  ;;  %s557_s8 = scalar_lea.hbm %s761_s5, 16 }
  0x1a   : > { %s436_s13 = sshll.u32 %s234_s12, 3  ;;  %vm292_vm1 = vcmp.lt.s32.totalorder %v291_v9, 4  ;;  %s435_s12 = sshll.u32 %s230_s11, 3 }
  0x1b   : > { %s236_s16 = scalar_lea.vmem %s756_s0, %s436_s13  ;;  %vm439_vm2 = vmneg %vm292_vm1  ;;  %s443_s13 = sshll.u32 %s662_s22, 3 }
  0x1c   : > { %v237_v0 = vld [vmem:[%s236_s16] sm:$0xff]  ;;  %s353_s16 = scalar_lea.hbm %s761_s5, %s443_s13 }
  0x1d   : > { %242 = vrot.lane.b32.xlu0 %v237_v0, %s608_s17  ;;  %s357_s25 = sshll.u32 %s353_s16, 4  ;;  %s358_s25 = int_to_ptr.hbm [resolvable:$true] %s357_s25 }
  0x1e   : > { %s551_s22 = sshra.s32 %s358_s25, 4  ;;  %s552_s22 = int_to_ptr.hbm [resolvable:$true] %s551_s22 }
  0x1f   : > { %s553_s30 = scalar_lea.hbm %s552_s22, 8  ;;  %p558_p3 = scmp.lt.s32.totalorder %s552_s22, %s761_s5 }
  0x20   : > { %p554_p0 = scmp.ne.s32.totalorder %s552_s22, %s553_s30  ;;  %p559_p4 = scmp.lt.s32.totalorder %s557_s8, %s553_s30 }
  0x22   : > { %p555_p1 = pnand %p554_p0, %p679_p5  ;;  %p560_p7 = por %p559_p4, %p558_p3 }
  0x24   : > { %p556_p2 = pneg %p555_p1 }
  0x25   : > { %239 = vrot.lane.b32.xlu0 %v237_v0, %s609_s23 }
  0x26   : > { %p561_p8 = pnand %p560_p7, %p556_p2 }
  0x2d   : > { %307 = vperm.xlu0 %506, %v304_v15  }
  0x8a   : > { %v252_v8 = vpop.permute.xlu1 %251 }
  0x8f   : > { %v243_v3 = vpop.permute.xlu0 %242 }
  0x90   : > { %279 = vmatpush.msra.mxu0 %v243_v3  ;;  %446 = vmatpush.msra.mxu2 %v243_v3 }
  0x97   : > { %v240_v4 = vpop.permute.xlu0 %239 }
  0x98   : > { %280 = vmatpush.msra.mxu0 %v240_v4  ;;  %447 = vmatpush.msra.mxu2 %v240_v4 }
  0x9a   : > { %281 = vmatpush.msra.mxu0 %v237_v0  ;;  %448 = vmatpush.msra.mxu2 %v237_v0 }
  0x9b   : > { %437 = vmatmul.msk.f32.vlgmr.msra.gmra.mxu0 %vm259_vm0, %v245_v5  ;;  %438 = vmatmul.msk.f32.vlgmr.msra.gmra.mxu2 %vm259_vm0, %v246_v6 }
  0x9f   : > { %v308_v22 = vpop.permute.xlu0 %307 }
 0x118   : > { %v283_v10 = vpop.f32.mrf.mxu0 }
 0x119   : > { %v284_v11 = vadd.f32 %v283_v10, %v252_v8 }
 0x11b   : > { %v289_v12 = vmax.f32 %v284_v11, 0.0 }
 0x11d   : > { %v295_v13 = vsel %vm292_vm1, 0.0, %v289_v12 }
 0x11e   : > { %297 = vrot.lane.b32.xlu2 %v295_v13, %s609_s23  ;;  %300 = vrot.lane.b32.xlu1 %v295_v13, %s608_s17  ;;  %v286_v18 = vpop.f32.mrf.mxu2 }
 0x126   : > { %256 = vperm.xlu2 %505, %v248_v14  }
 0x178   : > { %v298_v16 = vpop.permute.xlu2 %297 }
 0x180   : > { %v257_v17 = vpop.permute.xlu2 %256 }
 0x181   : > { %v287_v19 = vadd.f32 %v286_v18, %v257_v17 }
 0x183   : > { %335 = vrot.lane.b32.xlu1 %v287_v19, %s608_s17  ;;  %s232_s17 = scalar_lea.vmem [#allocation5], %s435_s12 }
 0x184   : > { %s355_s23 = sshll.u32 %s232_s17, 4  ;;  %s356_s23 = int_to_ptr.vmem [resolvable:$true] %s355_s23 }
 0x190   : > { %v301_v20 = vpop.permute.xlu1 %300 }
 0x191   : > { %326 = vmatpush.msra.mxu1 %v301_v20 }
 0x193   : > { %327 = vmatpush.msra.mxu1 %v298_v16 }
 0x195   : > { %440 = vmatpush.msk.msra.mxu1 %vm439_vm2, %v289_v12 }
 0x196   : > { %441 = vmatmul.msk.f32.vlgmr.msra.gmra.mxu1 %vm259_vm0, %v303_v21 }
 0x1f5   : > { %v336_v25 = vpop.permute.xlu1 %335 }
 0x213   : > { %v330_v23 = vpop.f32.mrf.mxu1 }
 0x214   : > { %v331_v24 = vadd.f32 %v330_v23, %v308_v22 }
 0x216   : > { %v333_v26 = vmax.f32 %v331_v24, 0.0 }
 0x218   : > { %v338_v27 = vadd.f32 %v336_v25, %v333_v26 }
 0x21a   : > { %v339_v28 = vmax.f32 %v338_v27, 0.0 }
 0x21c   : > { %341 = vst.msk [vmem:[%s232_s17] sm:$0xff] %vm340_vm3, %v339_v28 }
 0x21d   : > { %564 = shalt.err (!%p561_p8)
}
 0x21e   : > { %453 = dma.vmem_to_hbm [thread:$0]  (%p679_p5), %s356_s23, 128, %s358_s25, %s343_s26  }
 0x21f PF: > { %p465_p9 = scmp.ge.s32.totalorder %s603_s21, 2  ;;  %s369_s11 = sand.u32 1, %s591_s18  }
 0x220   : > { %s370_s12 = scalar_lea.sflag [#allocation4], %s369_s11 }
 0x221   : > { %p460_p10 = pnand %p465_p9, %p683_p6 }
 0x223   : > { %p461_p11 = pneg %p460_p10 }
 0x225   : > { %586 = dma.done.wait (%p461_p11), %s370_s12, 128  }
 0x226   : > { %588 = vsyncadd (%p461_p11), %s370_s12, 4294967168  ;;  %p16_p12 = scmp.ge.s32.totalorder %s666_s24, 4   ;;  %s764_s18 = smov %s595_s19 }
 0x227   : > { %s765_s19 = smov %s599_s20  ;;  %s766_s20 = smov %s677_s27 }
 0x228   : > { %s767_s21 = smov %s666_s24  ;;  %18 = sbr.rel (!%p16_p12) target bundleno = 4 (0x4), region = 80 }
 0x22d   :  { %376 = vsyncpa [#allocation3], 1 }
 0x22e   :  { %378 = vsyncpa [#allocation3 + $0x1], 1 }
 0x22f   :  { %379 = vsyncpa [#allocation4], 1 }
 0x230   :  { %381 = vsyncpa [#allocation4 + $0x1], 1 }

</bundles_post_ra>
